<compile_context>
chip_gen: v7x
topology: tpu7x:2x2x1
jax: 0.10.0
libtpu: 0.0.40
codegen_flags: <defaults>
</compile_context>

<pallas_src>
import functools

import numpy as np
import jax
import jax.numpy as jnp
from jax.experimental import pallas as pl
from jax.experimental.pallas import tpu as pltpu


# Channel-0 color bounds, computed in float32 exactly like the PyTorch module.
_LOWER0 = float(np.float32(100.0) / np.float32(255.0) - np.float32(0.15))
_UPPER0 = float(np.float32(200.0) / np.float32(255.0) + np.float32(0.15))
_MIN_RUN = 12  # "run length > 11"


def _round_up(x, m):
    return (x + m - 1) // m * m


# ---------------------------------------------------------------------------
# Kernel: per frame, gather the detection row (channel 0, platform_row),
# threshold it, and find the start of the first run of >= 12 in-range pixels.
# ---------------------------------------------------------------------------
def _platform_pos_kernel(obs_ref, out_ref, *, width, sub_row, lower, upper):
    # obs_ref: (TF, 8, Wp) raw-dtype frames (8-row group holding the platform
    #          row of channel 0); out_ref: (TF, 1) int32.
    x = obs_ref[:, sub_row, :].astype(jnp.float32)      # (TF, Wp) detection rows
    tf_, wp = x.shape
    col = jax.lax.broadcasted_iota(jnp.int32, (tf_, wp), 1)

    # In-range mask.  The last real column never extends a run (idx != W-1 in
    # the reference scan); columns >= W-1 (including undefined lanes of the
    # padded last block) are forced False by the same predicate.
    m = ((x >= lower) & (x <= upper) & (col < width - 1)).astype(jnp.int32)

    # Sliding-window AND over 12 consecutive columns via 4 XLU lane rotations
    # (doubling): the circular wrap is harmless because every window starting
    # in the last columns always contains the forced-False column >= W-1.
    p2 = m & pltpu.roll(m, wp - 1, 1)
    p4 = p2 & pltpu.roll(p2, wp - 2, 1)
    p8 = p4 & pltpu.roll(p4, wp - 4, 1)
    w12 = p8 & pltpu.roll(p4, wp - 8, 1)                 # AND of m[i .. i+11]

    # First qualifying run start = min column whose 12-window is all True.
    cand = jnp.where(w12 > 0, col, wp)
    pos = jnp.min(cand, axis=1, keepdims=True)           # (TF, 1)
    out_ref[...] = jnp.where(pos >= wp, -1, pos).astype(jnp.int32)


# ---------------------------------------------------------------------------
# Wrapper: BreakoutPlatformPosition.forward
# ---------------------------------------------------------------------------
def breakout_platform_position(observations):
    """observations: (bs, oc, C, H, W) -> (bs, oc) int32 positions."""
    obs = jnp.asarray(observations)                  # keep native dtype
    bs, oc, C, H, W = obs.shape
    platform_row = int((188.0 / 208.0) * H)

    R = bs * oc
    obs4 = obs.reshape(R, C, H, W)                   # metadata-only reshape

    Wp = _round_up(W, 128)                           # lane-aligned width block
    h_blk = platform_row // 8                        # 8-row group of the detection row
    sub_row = platform_row % 8                       # sublane within that group

    # Frames per tile: ~4 MiB per double-buffered input block, multiple of 8,
    # capped at 1024 (keeps grid >= 2 on large batches for the 2 v7x TCs).
    bytes_per_frame = 8 * Wp * obs.dtype.itemsize
    budget_frames = max(8, (4 * 1024 * 1024) // bytes_per_frame)
    TF = min(_round_up(R, 8), 1024, (budget_frames // 8) * 8)

    out = pl.pallas_call(
        functools.partial(_platform_pos_kernel, width=W, sub_row=sub_row,
                          lower=_LOWER0, upper=_UPPER0),
        out_shape=jax.ShapeDtypeStruct((R, 1), jnp.int32),
        grid=(pl.cdiv(R, TF),),
        in_specs=[pl.BlockSpec((TF, None, 8, Wp),
                               lambda i: (i, 0, h_blk, 0))],
        out_specs=pl.BlockSpec((TF, 1), lambda i: (i, 0)),
        compiler_params=pltpu.CompilerParams(
            dimension_semantics=("parallel",)),
    )(obs4)

    return out[:, 0].reshape(bs, oc)


# ---------------------------------------------------------------------------
# Exact scalar reference (mirrors the PyTorch detect_platform loop).
# ---------------------------------------------------------------------------
def _reference_numpy(obs):
    obs = np.asarray(obs, dtype=np.float32)
    bs, oc, _, H, W = obs.shape
    platform_row = int((188.0 / 208.0) * H)
    lb, ub = np.float32(_LOWER0), np.float32(_UPPER0)
    out = np.full((bs, oc), -1, dtype=np.int64)
    for b in range(bs):
        for o in range(oc):
            row = obs[b, o, 0, platform_row, :]
            mask = (row >= lb) & (row <= ub)
            length, start, res = 0, 0, -1
            for idx in range(W):
                if mask[idx] and idx != W - 1:
                    if length == 0:
                        start = idx
                    length += 1
                elif length > 0:
                    if length > 11:
                        res = start
                        break
                    length = 0
            out[b, o] = res
    return out


if __name__ == "__main__":
    key = jax.random.PRNGKey(0)
    bs, oc, C, H, W = 2, 3, 3, 16, 160
    obs = jax.random.uniform(key, (bs, oc, C, H, W), dtype=jnp.float32)
    platform_row = int((188.0 / 208.0) * H)  # = 14 for H=16

    # Craft a few deterministic detection rows (channel 0, platform row):
    # (0,0): platform of width 20 starting at col 40 -> expect 40
    r = jnp.zeros((W,), jnp.float32).at[40:60].set(200.0 / 255.0)
    obs = obs.at[0, 0, 0, platform_row, :].set(r)
    # (0,1): nothing in range -> expect -1
    obs = obs.at[0, 1, 0, platform_row, :].set(0.0)
    # (1,2): run of exactly 11 (ignored), then run of 15 at col 100 -> expect 100
    r = jnp.zeros((W,), jnp.float32).at[5:16].set(0.5).at[100:115].set(0.5)
    obs = obs.at[1, 2, 0, platform_row, :].set(r)

    out = jax.jit(breakout_platform_position)(obs)
    out = jax.block_until_ready(out)

    ref = _reference_numpy(obs)
    assert out.shape == (bs, oc), out.shape
    assert np.array_equal(np.asarray(out), ref), f"{np.asarray(out)} vs {ref}"
    assert int(out[0, 0]) == 40
    assert int(out[0, 1]) == -1
    assert int(out[1, 2]) == 100

    print("KERNEL_OK")
</pallas_src>

<mosaic_0001>
module attributes {stable_mosaic.version = 11 : i64} {
  func.func @_platform_pos_kernel(%arg0: i32, %arg1: memref<8x1x8x256xf32, #tpu.memory_space<vmem>>, %arg2: memref<8x1xi32, #tpu.memory_space<vmem>>) attributes {dimension_semantics = [#tpu.dimension_semantics<parallel>], iteration_bounds = array<i64: 1>, scalar_prefetch = 0 : i64, scratch_operands = 0 : i64, tpu.core_type = #tpu.core_type<tc>, window_params = [{transform_indices = @transform_0, window_bounds = array<i64: 8, 1, 8, 256>}, {transform_indices = @transform_1, window_bounds = array<i64: 8, 1>}]} {
    %c0 = arith.constant 0 : index
    %c0_0 = arith.constant 0 : index
    %c6 = arith.constant 6 : index
    %c0_1 = arith.constant 0 : index
    %0 = vector.load %arg1[%c0, %c0_0, %c6, %c0_1] : memref<8x1x8x256xf32, #tpu.memory_space<vmem>>, vector<8x1x1x256xf32>
    %1 = vector.shape_cast %0 : vector<8x1x1x256xf32> to vector<8x256xf32>
    %2 = tpu.iota {dimensions = array<i32: 1>} : vector<8x256xi32>
    %cst = arith.constant 0.242156863 : f32
    %3 = vector.broadcast %cst : f32 to vector<8x256xf32>
    %4 = arith.cmpf oge, %1, %3 : vector<8x256xf32>
    %cst_2 = arith.constant 0.934313774 : f32
    %5 = vector.broadcast %cst_2 : f32 to vector<8x256xf32>
    %6 = arith.cmpf ole, %1, %5 : vector<8x256xf32>
    %7 = arith.andi %4, %6 : vector<8x256xi1>
    %c159_i32 = arith.constant 159 : i32
    %8 = vector.broadcast %c159_i32 : i32 to vector<8x256xi32>
    %9 = arith.cmpi slt, %2, %8 : vector<8x256xi32>
    %10 = arith.andi %7, %9 : vector<8x256xi1>
    %11 = arith.extui %10 : vector<8x256xi1> to vector<8x256xi32>
    %c255_i32 = arith.constant 255 : i32
    %12 = tpu.dynamic_rotate %11 by %c255_i32 dim 1 : vector<8x256xi32>, i32 -> vector<8x256xi32>
    %13 = arith.andi %11, %12 : vector<8x256xi32>
    %c254_i32 = arith.constant 254 : i32
    %14 = tpu.dynamic_rotate %13 by %c254_i32 dim 1 : vector<8x256xi32>, i32 -> vector<8x256xi32>
    %15 = arith.andi %13, %14 : vector<8x256xi32>
    %c252_i32 = arith.constant 252 : i32
    %16 = tpu.dynamic_rotate %15 by %c252_i32 dim 1 : vector<8x256xi32>, i32 -> vector<8x256xi32>
    %17 = arith.andi %15, %16 : vector<8x256xi32>
    %c248_i32 = arith.constant 248 : i32
    %18 = tpu.dynamic_rotate %15 by %c248_i32 dim 1 : vector<8x256xi32>, i32 -> vector<8x256xi32>
    %19 = arith.andi %17, %18 : vector<8x256xi32>
    %c0_i32 = arith.constant 0 : i32
    %20 = vector.broadcast %c0_i32 : i32 to vector<8x256xi32>
    %21 = arith.cmpi sgt, %19, %20 : vector<8x256xi32>
    %c256_i32 = arith.constant 256 : i32
    %22 = vector.broadcast %c256_i32 : i32 to vector<8x256xi32>
    %23 = arith.select %21, %2, %22 : vector<8x256xi1>, vector<8x256xi32>
    %cst_3 = arith.constant dense<2147483647> : vector<8xi32>
    %24 = vector.multi_reduction <minsi>, %23, %cst_3 [1] : vector<8x256xi32> to vector<8xi32>
    %25 = vector.shape_cast %24 : vector<8xi32> to vector<8x1xi32>
    %c256_i32_4 = arith.constant 256 : i32
    %26 = vector.broadcast %c256_i32_4 : i32 to vector<8x1xi32>
    %27 = arith.cmpi sge, %25, %26 : vector<8x1xi32>
    %c-1_i32 = arith.constant -1 : i32
    %28 = vector.broadcast %c-1_i32 : i32 to vector<8x1xi32>
    %29 = arith.select %27, %28, %25 : vector<8x1xi1>, vector<8x1xi32>
    %c0_5 = arith.constant 0 : index
    %c0_6 = arith.constant 0 : index
    %30 = vector.load %arg2[%c0_5, %c0_6] : memref<8x1xi32, #tpu.memory_space<vmem>>, vector<8x1xi32>
    tpu.vector_store %arg2[%c0_5, %c0_6], %29 {strides = array<i32>} : memref<8x1xi32, #tpu.memory_space<vmem>>, vector<8x1xi32>,
    return
  }
  func.func @transform_0(%arg0: i32) -> (i32, i32, i32, i32) {
    %c0_i32 = arith.constant 0 : i32
    %c1_i32 = arith.constant 1 : i32
    %c0_i32_0 = arith.constant 0 : i32
    %c0_i32_1 = arith.constant 0 : i32
    return %arg0, %c0_i32, %c1_i32, %c0_i32_0 : i32, i32, i32, i32
  }
  func.func @transform_1(%arg0: i32) -> (i32, i32) {
    %c0_i32 = arith.constant 0 : i32
    %c0_i32_0 = arith.constant 0 : i32
    return %arg0, %c0_i32 : i32, i32
  }
}

</mosaic_0001>

<bundles_post_ra>
// kernel: squeeze.1
= control target key start
LH: loop header
LB: loop body
LE: loop exit
PB: predicated region body
PF: predicated region fallthrough
CT: control target
= control target key end

     0   :  { %s85_s0 = inlined_call_operand.vmem [shape: s32[6], index: 0, kind: input, shape index: {}]   ;;  %s86_s1 = inlined_call_operand.hbm [shape: s32[2,3], index: 1, kind: output, shape index: {}]  }
   0x1   :  { %v5_v0 = vld [vmem:[%s85_s0] sm:$0x1] }
   0x2   :  { %2 = vsyncpa [#allocation1], 0  ;;  %6 = vst [vmem:[#allocation3] sm:$0x1] %v5_v0  ;;  %vm8_vm0 = vcmask 23552   ;;  %s58_s0 = smov 125  }
   0x3   :  { %s59_s8 = smov [#allocation0]  }
   0x4   :  { %s26_s9 = sshll.u32 %s59_s8, 4  ;;  %s27_s9 = int_to_ptr.vmem [resolvable:$true] %s26_s9 }
   0x5   :  { %s34_s10 = scalar_lea.vmem %s27_s9, 32  ;;  %p39_p1 = scmp.lt.s32.totalorder %s27_s9, %s27_s9 }
   0x6   :  { %p35_p0 = scmp.ne.s32.totalorder %s27_s9, %s34_s10  ;;  %p40_p2 = scmp.lt.s32.totalorder %s34_s10, %s34_s10 }
   0x8   :  { %p41_p3 = por %p40_p2, %p39_p1 }
   0x9   :  { %v10_v1 = vld [vmem:[#allocation3] sm:$0x1]  }
   0xa   :  { %v7_v2 = vld [vmem:[#allocation3] sm:$0x1]   ;;  %11 = vrot.lane.b32.xlu0 %v10_v1, %s58_s0  ;;  %p42_p4 = pnand %p41_p3, %p35_p0 }
   0xb   :  { %9 = vst.msk [vmem:[#allocation2] sm:$0x1] %vm8_vm0, %v7_v2  }
  0x7c   :  { %v12_v3 = vpop.permute.xlu0 %11  }
  0x7d   :  { %15 = vst.msk [vmem:[#allocation2 + $0x1] sm:$0x1] %vm8_vm0, %v12_v3  }
  0x84   :  { %v19_v4 = vld [vmem:[#allocation2] sm:$0x3] }
  0x85   :  { %21 = vst [vmem:[#allocation0] sm:$0x3] %v19_v4 }
  0x86   :  { %45 = shalt.err (!%p42_p4)
}
  0x87   :  { %s46_s13 = scalar_lea.hbm %s86_s1, 32 }
  0x88   :  { %p47_p5 = scmp.ne.s32.totalorder %s86_s1, %s46_s13  ;;  %p50_p6 = scmp.lt.u32.totalorder %s46_s13, %s86_s1 }
  0x8a   :  { %p52_p7 = pnand %p50_p6, %p47_p5 }
  0x8c   :  { %55 = shalt.err (!%p52_p7)
}
  0x8d   :  { %29 = dma.vmem_to_hbm [thread:$0]  %s27_s9, 32, %s86_s1, [#allocation1]  }
  0x8e   :  { %56 = dma.done.wait [#allocation1], 32  }
  0x8f   :  { %57 = vsyncadd [#allocation1], 4294967264 }
  0x90   :  { %31 = vsyncpa [#allocation1], 1 }

// kernel: breakout_platform_position.1
= control target key start
LH: loop header
LB: loop body
LE: loop exit
PB: predicated region body
PF: predicated region fallthrough
CT: control target
= control target key end

     0   :  { %6 = vsyncpa [#allocation3], 0  ;;  %s1031_s0 = inlined_call_operand.hbm [shape: f32[6,3,16,160], index: 0, kind: input, shape index: {}]   ;;  %s1032_s1 = inlined_call_operand.vmem [shape: s32[6,1], index: 1, kind: output, shape index: {}]  }
   0x1   :  { %11 = vsyncadd [#allocation3], 512  ;;  %s12_s8 = scalar_lea.hbm %s1031_s0, 256  ;;  %s797_s9 = smov [#allocation2]  }
   0x2   :  { %s13_s10 = sshll.u32 %s797_s9, 4  ;;  %s794_s13 = scalar_lea.hbm %s1031_s0, 1792  ;;  %s14_s10 = int_to_ptr.vmem [resolvable:$true] %s13_s10 }
   0x3   :  { %p771_p0 = scmp.ne.s32.totalorder %s12_s8, %s794_s13  ;;  %s772_s16 = scalar_lea.hbm %s1031_s0, 9216 }
   0x4   :  { %p773_p1 = scmp.lt.u32.totalorder %s12_s8, %s1031_s0  ;;  %p774_p2 = scmp.lt.u32.totalorder %s772_s16, %s794_s13 }
   0x5   :  { %p776_p4 = scmp.lt.u32.totalorder %s794_s13, %s12_s8 }
   0x6   :  { %p775_p3 = por %p774_p2, %p773_p1 }
   0x8   :  { %p777_p5 = por %p776_p4, %p775_p3 }
   0xa   :  { %p778_p6 = pnand %p777_p5, %p771_p0 }
   0xc   :  { %781 = shalt.err (!%p778_p6)
}
   0xd   :  { %s782_s19 = scalar_lea.vmem %s14_s10, 1536  ;;  %s786_s20 = scalar_lea.vmem %s14_s10, 2048 }
   0xe   :  { %p783_p7 = scmp.ne.s32.totalorder %s14_s10, %s782_s19  ;;  %p787_p8 = scmp.lt.s32.totalorder %s14_s10, %s14_s10 }
   0xf   :  { %p788_p9 = scmp.lt.s32.totalorder %s786_s20, %s782_s19 }
  0x11   :  { %p789_p10 = por %p788_p9, %p787_p8 }
  0x13   :  { %p790_p11 = pnand %p789_p10, %p783_p7 }
  0x15   :  { %793 = shalt.err (!%p790_p11)
}
  0x16   :  { %s798_s21 = smov 1536   ;;  %s799_s22 = smov 256  }
  0x17   :  { %s800_s23 = smov 16  }
  0x18   :  { %19 = dma.hbm_to_vmem [thread:$0]  %s12_s8, 1536, %s14_s10, [#allocation3], %s798_s21, %s799_s22, %s800_s23  }
  0x19   :  { %795 = dma.done.wait [#allocation3], 2048  }
  0x1a   :  { %796 = vsyncadd [#allocation3], 4294965248  ;;  %v39_v0 = vlaneseq  ;;  %v801_v3 = vmov 1966171168   ;;  %v802_v16 = vmov 0   ;;  %v803_v19 = vmov 1  }
  0x1b   :  { %v73_v4 = vunpack.c.l.s4 %v801_v3  ;;  %v24_v6 = vld [vmem:[#allocation2 + $0x6] ss:$8 sm:$0x3]  ;;  %v26_v7 = vld [vmem:[#allocation2 + $0x16] ss:$8 sm:$0x3] }
  0x1c   :  { %v830_v1 = vand.u32 127, %v39_v0  ;;  %v76_v5 = vshrl.u32 %v39_v0, 7  ;;  %v28_v9 = vld [vmem:[#allocation2 + $0x26] ss:$8 sm:$0x3]  ;;  %v1044_v32 = vmov 0 }
  0x1d   :  { %v74_v8 = vunpack.c.0.s8 %v73_v4  ;;  %v30_v10 = vld [vmem:[#allocation2 + $0x36] ss:$8 sm:$0x3]  ;;  %v32_v11 = vld [vmem:[#allocation2 + $0x46] ss:$8 sm:$0x3] }
  0x1e   :  { %v833_v2 = vadd.s32 128, %v830_v1  ;;  %v34_v12 = vld [vmem:[#allocation2 + $0x56] ss:$8 sm:$0x3]  ;;  %vm42_vm1 = vcmp.ge.f32.partialorder %v24_v6, 0.24215686 }
  0x1f   :  { %v36_v13 = vld [vmem:[#allocation2 + $0x66] ss:$8 sm:$0x3]  ;;  %vm50_vm2 = vcmp.le.f32.partialorder %v24_v6, 0.9343138  ;;  %v836_v15 = vsub.s32 %v74_v8, %v76_v5  ;;  %v1046_v33 = vmov 0 }
  0x20   :  { %vm67_vm0 = vcmp.lt.s32.totalorder %v833_v2, 159  ;;  %v38_v14 = vld [vmem:[#allocation2 + $0x76] ss:$8 sm:$0x3]  ;;  %vm43_vm3 = vcmp.ge.f32.partialorder %v26_v7, 0.24215686  ;;  %vm841_vm9 = vmand %vm42_vm1, %vm50_vm2 }
  0x21   :  { %vm51_vm4 = vcmp.le.f32.partialorder %v26_v7, 0.9343138  ;;  %vm44_vm5 = vcmp.ge.f32.partialorder %v28_v9, 0.24215686  ;;  %vm52_vm6 = vcmp.le.f32.partialorder %v28_v9, 0.9343138 }
  0x22   :  { %v69_v17 = vsel %vm67_vm0, 1, %v802_v16  ;;  %vm45_vm7 = vcmp.ge.f32.partialorder %v30_v10, 0.24215686  ;;  %vm53_vm8 = vcmp.le.f32.partialorder %v30_v10, 0.9343138  ;;  %vm847_vm13 = vmand %vm43_vm3, %vm51_vm4  ;;  %v1048_v37 = vmov 0 }
  0x23   :  { %v70_v20 = vcombine.low %v803_v19, %v69_v17  ;;  %v71_v21 = vcombine.high %v803_v19, %v69_v17  ;;  %vm46_vm10 = vcmp.ge.f32.partialorder %v32_v11, 0.24215686  ;;  %vm54_vm12 = vcmp.le.f32.partialorder %v32_v11, 0.9343138  ;;  %vm853_vm0 = vmand %vm44_vm5, %vm52_vm6  ;;  %s804_s0 = smov 127   ;;  %s805_s24 = smov 126  }
  0x24   :  { %vm48_vm14 = vcmp.ge.f32.partialorder %v36_v13, 0.24215686  ;;  %vm55_vm15 = vcmp.le.f32.partialorder %v34_v12, 0.9343138  ;;  %vm49_vm1 = vcmp.ge.f32.partialorder %v38_v14, 0.24215686  ;;  %vm861_vm3 = vmand %vm45_vm7, %vm53_vm8 }
  0x25   :  { %v78_v24 = vrot.slane %v70_v20, %v836_v15  ;;  %v85_v25 = vrot.slane %v71_v21, %v836_v15  ;;  %vm56_vm2 = vcmp.le.f32.partialorder %v36_v13, 0.9343138  ;;  %vm57_vm11 = vcmp.le.f32.partialorder %v38_v14, 0.9343138  ;;  %vm865_vm4 = vmand %vm46_vm10, %vm54_vm12  ;;  %s806_s25 = smov 124   ;;  %s807_s26 = smov 120  }
  0x26   :  { %vm1043_vm5 = vcmp.ge.f32.partialorder %v34_v12, 0.24215686  ;;  %vm877_vm7 = vmand %vm48_vm14, %vm56_vm2 }
  0x27   :  { %v86_v28 = vcombine.high %v78_v24, %v78_v24  ;;  %v87_v29 = vcombine.high %v85_v25, %v85_v25  ;;  %v94_v30 = vrot.slane %v78_v24, %v836_v15  ;;  %v101_v31 = vrot.slane %v85_v25, %v836_v15  ;;  %vm872_vm6 = vmand %vm1043_vm5, %vm55_vm15 }
  0x28   :  { %v1045_v32 = vsel %vm872_vm6, 4294967295, %v1044_v32  ;;  %v1047_v33 = vsel %vm877_vm7, 4294967295, %v1046_v33  ;;  %vm883_vm8 = vmand %vm49_vm1, %vm57_vm11 }
  0x29   :  { %v108_v34 = vrot.slane %v86_v28, %v836_v15  ;;  %v115_v35 = vrot.slane %v87_v29, %v836_v15  ;;  %v116_v36 = vcombine.high %v94_v30, %v94_v30  ;;  %v1049_v37 = vsel %vm883_vm8, 4294967295, %v1048_v37 }
  0x2a   :  { %v117_v38 = vcombine.high %v101_v31, %v101_v31  ;;  %vm120_vm10 = vcmp.ne.s32.totalorder %v94_v30, 0  ;;  %vm124_vm2 = vcmp.ne.s32.totalorder %v101_v31, 0 }
  0x2b   :  { %v118_v39 = vcombine.high %v108_v34, %v108_v34  ;;  %v119_v40 = vcombine.high %v115_v35, %v115_v35  ;;  %vm121_vm12 = vcmp.ne.s32.totalorder %v108_v34, 0  ;;  %vm122_vm15 = vcmp.ne.s32.totalorder %v116_v36, 0  ;;  %vm128_vm14 = vmand %vm841_vm9, %vm120_vm10 }
  0x2c   :  { %vm129_vm5 = vmand %vm847_vm13, %vm121_vm12  ;;  %v136_v41 = vsel %vm128_vm14, 1, %v802_v16  ;;  %vm125_vm11 = vcmp.ne.s32.totalorder %v115_v35, 0  ;;  %vm126_vm8 = vcmp.ne.s32.totalorder %v117_v38, 0  ;;  %vm1050_vm10 = vnez %v1045_v32 }
  0x2d   :  { %vm123_vm7 = vcmp.ne.s32.totalorder %v118_v39, 0  ;;  %vm130_vm1 = vmand %vm853_vm0, %vm122_vm15  ;;  %v137_v42 = vsel %vm129_vm5, 1, %v802_v16  ;;  %vm127_vm9 = vcmp.ne.s32.totalorder %v119_v40, 0  ;;  %vm1051_vm0 = vnez %v1047_v33 }
  0x2e   :  { %vm131_vm6 = vmand %vm861_vm3, %vm123_vm7  ;;  %v138_v43 = vsel %vm130_vm1, 1, %v802_v16  ;;  %v144_v44 = vcombine.low %v136_v41, %v137_v42  ;;  %vm1052_vm7 = vnez %v1049_v37  ;;  %vm541_vm14 = vcmp.lt.s32.totalorder %v830_v1, 120 }
  0x2f   :  { %vm132_vm13 = vmand %vm865_vm4, %vm124_vm2  ;;  %v139_v45 = vsel %vm131_vm6, 1, %v802_v16  ;;  %vm214_vm4 = vcmp.lt.s32.totalorder %v830_v1, 127  ;;  %vm345_vm6 = vcmp.lt.s32.totalorder %v830_v1, 126 }
  0x30   :  { %vm133_vm12 = vmand %vm1050_vm10, %vm125_vm11  ;;  %v140_v46 = vsel %vm132_vm13, 1, %v802_v16  ;;  %v145_v47 = vcombine.low %v138_v43, %v139_v45  ;;  %v154_v48 = vrot.slane %v144_v44, %v836_v15 }
  0x31   :  { %vm134_vm3 = vmand %vm1051_vm0, %vm126_vm8  ;;  %v141_v49 = vsel %vm133_vm12, 1, %v802_v16  ;;  %vm476_vm8 = vcmp.lt.s32.totalorder %v830_v1, 124 }
  0x32   :  { %vm135_vm15 = vmand %vm1052_vm7, %vm127_vm9  ;;  %v142_v50 = vsel %vm134_vm3, 1, %v802_v16  ;;  %v146_v51 = vcombine.low %v140_v46, %v141_v49  ;;  %v161_v52 = vrot.slane %v145_v47, %v836_v15  ;;  %vm752_vm7 = vcmask 7168  }
  0x33   :  { %v143_v53 = vsel %vm135_vm15, 1, %v802_v16 }
  0x34   :  { %v147_v54 = vcombine.low %v142_v50, %v143_v53  ;;  %v168_v55 = vrot.slane %v146_v51, %v836_v15  ;;  %v176_v56 = vcombine.low %v154_v48, %v161_v52  ;;  %v177_v58 = vcombine.high %v154_v48, %v161_v52 }
  0x36   :  { %v175_v57 = vrot.slane %v147_v54, %v836_v15  ;;  %v186_v60 = vrot.slane %v176_v56, %v836_v15  ;;  %v193_v63 = vrot.slane %v177_v58, %v836_v15 }
  0x38   :  { %v178_v59 = vcombine.low %v168_v55, %v175_v57  ;;  %v179_v61 = vcombine.high %v168_v55, %v175_v57 }
  0x3a   :  { %v200_v62 = vrot.slane %v178_v59, %v836_v15  ;;  %v207_v0 = vrot.slane %v179_v61, %v836_v15 }
  0x3c   :  { %v208_v3 = vcombine.low %v186_v60, %v200_v62  ;;  %v209_v4 = vcombine.low %v193_v63, %v207_v0 }
  0x3e   :  { %210 = vrot.lane.b32.xlu0 %v208_v3, %s804_s0 }
  0x42   :  { %212 = vrot.lane.b32.xlu0 %v209_v4, %s804_s0 }
  0xb0   :  { %v211_v5 = vpop.permute.xlu0 %210 }
  0xb4   :  { %v213_v6 = vpop.permute.xlu0 %212 }
  0xb5   :  { %v215_v7 = vsel %vm214_vm4, %v211_v5, %v213_v6  ;;  %v216_v8 = vsel %vm214_vm4, %v213_v6, %v211_v5 }
  0xb6   :  { %v217_v9 = vcombine.low %v215_v7, %v216_v8  ;;  %v218_v10 = vcombine.high %v215_v7, %v216_v8 }
  0xb8   :  { %v225_v11 = vrot.slane %v217_v9, %v836_v15  ;;  %v232_v12 = vrot.slane %v218_v10, %v836_v15 }
  0xba   :  { %v233_v13 = vcombine.high %v225_v11, %v225_v11  ;;  %v234_v14 = vcombine.high %v232_v12, %v232_v12  ;;  %v241_v16 = vrot.slane %v225_v11, %v836_v15  ;;  %v248_v17 = vrot.slane %v232_v12, %v836_v15 }
  0xbc   :  { %v255_v18 = vrot.slane %v233_v13, %v836_v15  ;;  %v262_v19 = vrot.slane %v234_v14, %v836_v15  ;;  %v263_v20 = vcombine.high %v241_v16, %v241_v16  ;;  %v264_v21 = vcombine.high %v248_v17, %v248_v17 }
  0xbd   :  { %v267_v24 = vand.u32 %v241_v16, %v136_v41  ;;  %v271_v27 = vand.u32 %v248_v17, %v140_v46 }
  0xbe   :  { %v265_v22 = vcombine.high %v255_v18, %v255_v18  ;;  %v266_v23 = vcombine.high %v262_v19, %v262_v19  ;;  %v268_v25 = vand.u32 %v255_v18, %v137_v42  ;;  %v269_v26 = vand.u32 %v263_v20, %v138_v43 }
  0xbf   :  { %v272_v28 = vand.u32 %v262_v19, %v141_v49  ;;  %v273_v29 = vand.u32 %v264_v21, %v142_v50 }
  0xc0   :  { %v270_v30 = vand.u32 %v265_v22, %v139_v45  ;;  %v274_v31 = vand.u32 %v266_v23, %v143_v53  ;;  %v275_v32 = vcombine.low %v267_v24, %v268_v25 }
  0xc1   :  { %v277_v33 = vcombine.low %v271_v27, %v272_v28 }
  0xc2   :  { %v276_v34 = vcombine.low %v269_v26, %v270_v30  ;;  %v278_v35 = vcombine.low %v273_v29, %v274_v31  ;;  %v285_v36 = vrot.slane %v275_v32, %v836_v15 }
  0xc3   :  { %v299_v38 = vrot.slane %v277_v33, %v836_v15  ;;  %v610_v33 = vcombine.low %v830_v1, %v833_v2 }
  0xc4   :  { %v292_v37 = vrot.slane %v276_v34, %v836_v15  ;;  %v306_v39 = vrot.slane %v278_v35, %v836_v15  ;;  %v611_v34 = vcombine.high %v830_v1, %v833_v2 }
  0xc5   :  { %v618_v35 = vrot.slane %v610_v33, %v836_v15 }
  0xc6   :  { %v307_v40 = vcombine.low %v285_v36, %v292_v37  ;;  %v309_v41 = vcombine.low %v299_v38, %v306_v39  ;;  %v308_v42 = vcombine.high %v285_v36, %v292_v37  ;;  %v310_v43 = vcombine.high %v299_v38, %v306_v39 }
  0xc7   :  { %v625_v36 = vrot.slane %v611_v34, %v836_v15 }
  0xc8   :  { %v317_v44 = vrot.slane %v307_v40, %v836_v15  ;;  %v331_v45 = vrot.slane %v309_v41, %v836_v15  ;;  %v324_v47 = vrot.slane %v308_v42, %v836_v15  ;;  %v338_v48 = vrot.slane %v310_v43, %v836_v15 }
  0xc9   :  { %v626_v41 = vcombine.high %v618_v35, %v618_v35  ;;  %v627_v42 = vcombine.high %v625_v36, %v625_v36  ;;  %v985_v2 = vrot.slane %v625_v36, %v836_v15 }
  0xca   :  { %v339_v46 = vcombine.low %v317_v44, %v331_v45  ;;  %v340_v49 = vcombine.low %v324_v47, %v338_v48  ;;  %v982_v45 = vrot.slane %v618_v35, %v836_v15 }
  0xcc   :  { %341 = vrot.lane.b32.xlu1 %v339_v46, %s805_s24 }
  0xd0   :  { %343 = vrot.lane.b32.xlu1 %v340_v49, %s805_s24 }
 0x13e   :  { %v342_v50 = vpop.permute.xlu1 %341 }
 0x142   :  { %v344_v51 = vpop.permute.xlu1 %343 }
 0x143   :  { %v346_v52 = vsel %vm345_vm6, %v342_v50, %v344_v51  ;;  %v347_v53 = vsel %vm345_vm6, %v344_v51, %v342_v50  ;;  %v648_v50 = vrot.slane %v626_v41, %v836_v15  ;;  %v991_v51 = vrot.slane %v627_v42, %v836_v15 }
 0x144   :  { %v348_v54 = vcombine.low %v346_v52, %v347_v53  ;;  %v349_v55 = vcombine.high %v346_v52, %v347_v53 }
 0x146   :  { %v356_v56 = vrot.slane %v348_v54, %v836_v15  ;;  %v363_v57 = vrot.slane %v349_v55, %v836_v15 }
 0x148   :  { %v364_v58 = vcombine.high %v356_v56, %v356_v56  ;;  %v365_v59 = vcombine.high %v363_v57, %v363_v57  ;;  %v372_v60 = vrot.slane %v356_v56, %v836_v15  ;;  %v379_v61 = vrot.slane %v363_v57, %v836_v15 }
 0x149   :  { %v656_v57 = vcombine.high %v982_v45, %v982_v45 }
 0x14a   :  { %v386_v62 = vrot.slane %v364_v58, %v836_v15  ;;  %v393_v63 = vrot.slane %v365_v59, %v836_v15  ;;  %v394_v0 = vcombine.high %v372_v60, %v372_v60  ;;  %v395_v3 = vcombine.high %v379_v61, %v379_v61 }
 0x14b   :  { %v941_v6 = vand.u32 %v372_v60, %v267_v24  ;;  %v947_v9 = vand.u32 %v379_v61, %v271_v27  ;;  %v657_v58 = vcombine.high %v985_v2, %v985_v2 }
 0x14c   :  { %v396_v4 = vcombine.high %v386_v62, %v386_v62  ;;  %v397_v5 = vcombine.high %v393_v63, %v393_v63  ;;  %v943_v7 = vand.u32 %v386_v62, %v268_v25  ;;  %v945_v8 = vand.u32 %v394_v0, %v269_v26 }
 0x14d   :  { %v949_v10 = vand.u32 %v393_v63, %v272_v28  ;;  %v953_v12 = vand.u32 %v395_v3, %v273_v29  ;;  %v658_v3 = vcombine.high %v648_v50, %v648_v50 }
 0x14e   :  { %v951_v11 = vand.u32 %v396_v4, %v270_v30  ;;  %v955_v13 = vand.u32 %v397_v5, %v274_v31  ;;  %v406_v14 = vcombine.low %v941_v6, %v943_v7  ;;  %v659_v4 = vcombine.high %v991_v51, %v991_v51 }
 0x14f   :  { %v408_v16 = vcombine.low %v947_v9, %v949_v10 }
 0x150   :  { %v407_v17 = vcombine.low %v945_v8, %v951_v11  ;;  %v409_v18 = vcombine.low %v953_v12, %v955_v13  ;;  %v416_v19 = vrot.slane %v406_v14, %v836_v15 }
 0x151   :  { %v430_v21 = vrot.slane %v408_v16, %v836_v15 }
 0x152   :  { %v423_v20 = vrot.slane %v407_v17, %v836_v15  ;;  %v437_v22 = vrot.slane %v409_v18, %v836_v15 }
 0x154   :  { %v439_v23 = vcombine.high %v416_v19, %v423_v20  ;;  %v441_v24 = vcombine.high %v430_v21, %v437_v22  ;;  %v438_v25 = vcombine.low %v416_v19, %v423_v20  ;;  %v440_v26 = vcombine.low %v430_v21, %v437_v22 }
 0x156   :  { %v455_v27 = vrot.slane %v439_v23, %v836_v15  ;;  %v469_v28 = vrot.slane %v441_v24, %v836_v15  ;;  %v448_v29 = vrot.slane %v438_v25, %v836_v15  ;;  %v462_v30 = vrot.slane %v440_v26, %v836_v15 }
 0x158   :  { %v471_v31 = vcombine.low %v455_v27, %v469_v28  ;;  %v470_v32 = vcombine.low %v448_v29, %v462_v30 }
 0x15a   :  { %474 = vrot.lane.b32.xlu1 %v471_v31, %s806_s25  ;;  %472 = vrot.lane.b32.xlu0 %v470_v32, %s806_s25 }
 0x15e   :  { %539 = vrot.lane.b32.xlu1 %v471_v31, %s807_s26  ;;  %537 = vrot.lane.b32.xlu0 %v470_v32, %s807_s26 }
 0x1cc   :  { %v475_v37 = vpop.permute.xlu1 %474  ;;  %v473_v38 = vpop.permute.xlu0 %472 }
 0x1cd   :  { %v477_v39 = vsel %vm476_vm8, %v473_v38, %v475_v37  ;;  %v478_v40 = vsel %vm476_vm8, %v475_v37, %v473_v38 }
 0x1ce   :  { %v479_v43 = vcombine.low %v477_v39, %v478_v40  ;;  %v480_v44 = vcombine.high %v477_v39, %v478_v40 }
 0x1d0   :  { %v487_v46 = vrot.slane %v479_v43, %v836_v15  ;;  %v494_v47 = vrot.slane %v480_v44, %v836_v15  ;;  %v540_v48 = vpop.permute.xlu1 %539  ;;  %v538_v49 = vpop.permute.xlu0 %537 }
 0x1d1   :  { %v542_v52 = vsel %vm541_vm14, %v538_v49, %v540_v48  ;;  %v543_v53 = vsel %vm541_vm14, %v540_v48, %v538_v49 }
 0x1d2   :  { %v495_v1 = vcombine.high %v487_v46, %v487_v46  ;;  %v496_v54 = vcombine.high %v494_v47, %v494_v47  ;;  %v503_v55 = vrot.slane %v487_v46, %v836_v15  ;;  %v510_v56 = vrot.slane %v494_v47, %v836_v15 }
 0x1d3   :  { %v544_v59 = vcombine.low %v542_v52, %v543_v53  ;;  %v545_v60 = vcombine.high %v542_v52, %v543_v53 }
 0x1d4   :  { %v517_v61 = vrot.slane %v495_v1, %v836_v15  ;;  %v524_v62 = vrot.slane %v496_v54, %v836_v15  ;;  %v525_v63 = vcombine.high %v503_v55, %v503_v55  ;;  %v526_v0 = vcombine.high %v510_v56, %v510_v56 }
 0x1d5   :  { %v552_v5 = vrot.slane %v544_v59, %v836_v15  ;;  %v559_v14 = vrot.slane %v545_v60, %v836_v15  ;;  %v529_v18 = vand.u32 %v503_v55, %v941_v6  ;;  %v533_v19 = vand.u32 %v510_v56, %v947_v9 }
 0x1d6   :  { %v527_v16 = vcombine.high %v517_v61, %v517_v61  ;;  %v528_v17 = vcombine.high %v524_v62, %v524_v62  ;;  %v530_v20 = vand.u32 %v517_v61, %v943_v7  ;;  %v531_v21 = vand.u32 %v525_v63, %v945_v8 }
 0x1d7   :  { %v560_v22 = vcombine.high %v552_v5, %v552_v5  ;;  %v561_v23 = vcombine.high %v559_v14, %v559_v14  ;;  %v534_v24 = vand.u32 %v524_v62, %v949_v10  ;;  %v535_v25 = vand.u32 %v526_v0, %v953_v12 }
 0x1d8   :  { %v568_v26 = vrot.slane %v552_v5, %v836_v15  ;;  %v575_v27 = vrot.slane %v559_v14, %v836_v15  ;;  %v532_v28 = vand.u32 %v527_v16, %v951_v11  ;;  %v536_v6 = vand.u32 %v528_v17, %v955_v13 }
 0x1d9   :  { %v582_v9 = vrot.slane %v560_v22, %v836_v15  ;;  %v589_v7 = vrot.slane %v561_v23, %v836_v15 }
 0x1da   :  { %v590_v29 = vcombine.high %v568_v26, %v568_v26  ;;  %v591_v8 = vcombine.high %v575_v27, %v575_v27  ;;  %v594_v30 = vand.u32 %v568_v26, %v529_v18  ;;  %v598_v31 = vand.u32 %v575_v27, %v533_v19 }
 0x1db   :  { %v592_v32 = vcombine.high %v582_v9, %v582_v9  ;;  %v593_v10 = vcombine.high %v589_v7, %v589_v7  ;;  %v595_v33 = vand.u32 %v582_v9, %v530_v20  ;;  %v599_v12 = vand.u32 %v589_v7, %v534_v24 }
 0x1dc   :  { %v596_v34 = vand.u32 %v590_v29, %v531_v21  ;;  %v600_v35 = vand.u32 %v591_v8, %v535_v25  ;;  %vm602_vm2 = vcmp.gt.s32.totalorder %v594_v30, 0  ;;  %vm606_vm5 = vcmp.gt.s32.totalorder %v598_v31, 0 }
 0x1dd   :  { %v597_v36 = vand.u32 %v592_v32, %v532_v28  ;;  %v601_v11 = vand.u32 %v593_v10, %v536_v6  ;;  %vm603_vm11 = vcmp.gt.s32.totalorder %v595_v33, 0  ;;  %vm607_vm1 = vcmp.gt.s32.totalorder %v599_v12, 0 }
 0x1de   :  { %vm604_vm9 = vcmp.gt.s32.totalorder %v596_v34, 0  ;;  %vm608_vm13 = vcmp.gt.s32.totalorder %v600_v35, 0  ;;  %v660_v13 = vsel %vm602_vm2, %v982_v45, 256  ;;  %v661_v37 = vsel %vm603_vm11, %v648_v50, 256 }
 0x1df   :  { %vm605_vm10 = vcmp.gt.s32.totalorder %v597_v36, 0  ;;  %vm609_vm12 = vcmp.gt.s32.totalorder %v601_v11, 0  ;;  %v662_v38 = vsel %vm604_vm9, %v656_v57, 256  ;;  %v664_v39 = vsel %vm606_vm5, %v985_v2, 256 }
 0x1e0   :  { %v663_v40 = vsel %vm605_vm10, %v658_v3, 256  ;;  %v665_v41 = vsel %vm607_vm1, %v991_v51, 256  ;;  %v666_v42 = vsel %vm608_vm13, %v657_v58, 256  ;;  %v667_v43 = vsel %vm609_vm12, %v659_v4, 256 }
 0x1e1   :  { %v668_v44 = vcombine.low %v660_v13, %v661_v37  ;;  %v669_v46 = vcombine.low %v662_v38, %v663_v40  ;;  %v670_v47 = vcombine.low %v664_v39, %v665_v41  ;;  %v671_v48 = vcombine.low %v666_v42, %v667_v43 }
 0x1e3   :  { %v678_v49 = vrot.slane %v668_v44, %v836_v15  ;;  %v685_v52 = vrot.slane %v669_v46, %v836_v15  ;;  %v692_v45 = vrot.slane %v670_v47, %v836_v15  ;;  %v699_v50 = vrot.slane %v671_v48, %v836_v15 }
 0x1e5   :  { %v700_v53 = vcombine.low %v678_v49, %v685_v52  ;;  %v701_v1 = vcombine.high %v678_v49, %v685_v52  ;;  %v702_v2 = vcombine.low %v692_v45, %v699_v50  ;;  %v703_v54 = vcombine.high %v692_v45, %v699_v50 }
 0x1e7   :  { %v710_v51 = vrot.slane %v700_v53, %v836_v15  ;;  %v717_v55 = vrot.slane %v701_v1, %v836_v15  ;;  %v724_v56 = vrot.slane %v702_v2, %v836_v15  ;;  %v731_v57 = vrot.slane %v703_v54, %v836_v15 }
 0x1e9   :  { %v732_v58 = vcombine.low %v710_v51, %v724_v56  ;;  %v733_v59 = vcombine.low %v717_v55, %v731_v57 }
 0x1eb   :  { %vm734_vm0 = vcmp.lt.s32.totalorder %v732_v58, %v733_v59 }
 0x1ec   :  { %v735_v60 = vsel %vm734_vm0, %v732_v58, %v733_v59 }
 0x1ed   :  { %v737_v61 = vshra.s32 %v735_v60, 16  ;;  %v736_v63 = vand.u32 65535, %v735_v60 }
 0x1ef   :  { %v739_v62 = vcvt.s32.f32 %v737_v61  ;;  %v738_v3 = vcvt.s32.f32 %v736_v63 }
 0x1f1   :  { %740 = vmin.xlane.f32.xlu0 %v739_v62 }
 0x27e   :  { %v741_v0 = vpop.xlane.xlu0 %740 }
 0x27f   :  { %vm742_vm3 = vcmp.eq.f32.partialorder %v739_v62, %v741_v0  ;;  %v747_v5 = vcvt.f32.s32 %v741_v0 }
 0x280   :  { %v743_v4 = vsel %vm742_vm3, %v738_v3, inf }
 0x281   :  { %744 = vmin.xlane.f32.xlu1 %v743_v4  ;;  %v748_v16 = vshll.u32 %v747_v5, 16 }
 0x30e   :  { %v745_v14 = vpop.xlane.xlu1 %744 }
 0x30f   :  { %v746_v17 = vcvt.f32.s32 %v745_v14 }
 0x311   :  { %v749_v18 = vadd.s32 %v748_v16, %v746_v17 }
 0x313   :  { %vm750_vm15 = vcmp.ge.s32.totalorder %v749_v18, 256 }
 0x314   :  { %v751_v15 = vsel %vm750_vm15, 4294967295, %v749_v18 }
 0x315   :  { %753 = vst.msk [vmem:[%s1032_s1] sm:$0xff] %vm752_vm7, %v751_v15 }
 0x316   :  { %758 = vsyncpa [#allocation3], 1 }

</bundles_post_ra>
